<compile_context>
chip_gen: v5e
topology: v5e:2x2
jax: 0.10.0
libtpu: 0.0.40
codegen_flags: <defaults>
</compile_context>

<pallas_src>
import jax
import jax.numpy as jnp
from jax.experimental import pallas as pl
from jax.experimental.pallas import tpu as pltpu


def _round_up(x, m):
    return ((x + m - 1) // m) * m


def _resident_spec(block_shape):
    """Constant-index (VMEM-resident) BlockSpec; single-buffered when supported."""
    index_map = lambda i, _n=len(block_shape): (0,) * _n
    if hasattr(pl, "Buffered"):
        try:
            # Weights are never re-fetched (constant index map); one buffer is enough.
            return pl.BlockSpec(block_shape, index_map, pipeline_mode=pl.Buffered(1))
        except TypeError:
            pass
    return pl.BlockSpec(block_shape, index_map)


def _make_attn_net_kernel(single_logit: bool, compute_dtype):
    def kernel(x_ref, w1_ref, b1_ref, w2_ref, b2_ref, out_ref):
        # Layer 1 on the MXU: per-tile cast to bf16 (x read from HBM once, in its
        # original dtype), f32 accumulation.
        x = x_ref[...].astype(compute_dtype)
        h = jnp.dot(x, w1_ref[...], preferred_element_type=jnp.float32)
        h = jnp.tanh(h + b1_ref[...])                          # (block_n, D) f32

        if single_logit:
            # Linear(D, 1) as a VPU multiply + lane reduction against the resident
            # (1, D) weight row (avoids a 1-lane MXU output); scalar bias from SMEM.
            a = (jnp.sum(h * w2_ref[...], axis=-1, keepdims=True)
                 + b2_ref[0, 0])                               # (block_n, 1)
        else:
            # Linear(D, C) for small C: tiny f32 matmul, hidden under layer 1.
            a = (jnp.dot(h, w2_ref[...], preferred_element_type=jnp.float32)
                 + b2_ref[...])                                # (block_n, C)

        # Lane-dense store: output block is (C, block_n), block_n % 128 == 0, so the
        # writeback is an unmasked full-lane vst (XLU transpose is a free slot
        # under the MXU).
        out_ref[...] = a.T.astype(out_ref.dtype)

    return kernel


def attn_net_forward(params, x, *, block_n=512, compute_dtype=jnp.bfloat16,
                     interpret=False):
    """Attn_Net.forward(x) -> (A, x), A of shape (N, n_classes)."""
    N, L = x.shape
    D = params["w1"].shape[1]
    C = params["w2"].shape[1]

    # ---- Row tiling -------------------------------------------------------------
    # Lane-dense output blocks require block_n to be a multiple of 128.
    block_n = max(128, _round_up(block_n, 128))
    # No point in a tile (much) larger than the bag itself.
    block_n = min(block_n, _round_up(max(N, 1), 128))
    # Keep >= 2 grid steps for moderate/large bags so v7x's two TensorCores both
    # get work (no effect on single-TC v5e/v6e).
    if N > 128:
        block_n = min(block_n, max(128, _round_up(pl.cdiv(N, 2), 128)))
    grid_n = pl.cdiv(N, block_n)

    # ---- Operands ---------------------------------------------------------------
    w1_c = params["w1"].astype(compute_dtype)                 # (L, D), resident, cast once
    b1 = params["b1"].astype(jnp.float32).reshape(1, D)

    single_logit = (C == 1)
    if single_logit:
        w2_arg = params["w2"].astype(jnp.float32).T            # (1, D) row
        b2_arg = params["b2"].astype(jnp.float32).reshape(1, 1)
        w2_spec = _resident_spec((1, D))
        b2_spec = pl.BlockSpec(memory_space=pltpu.MemorySpace.SMEM)
    else:
        w2_arg = params["w2"].astype(jnp.float32)               # (D, C)
        b2_arg = params["b2"].astype(jnp.float32).reshape(1, C)
        w2_spec = _resident_spec((D, C))
        b2_spec = _resident_spec((1, C))

    # ---- VMEM budget (derived, not hardcoded; capped for v7x's 64 MiB/TC) --------
    buf_bytes = (
        2 * block_n * L * x.dtype.itemsize        # x tiles (double-buffered, input dtype)
        + block_n * L * 2                         # in-kernel bf16 copy of the x tile
        + 2 * L * D * 2                           # w1 (bf16), 2 bufs if Buffered(1) unavailable
        + 2 * D * 4                               # b1
        + 2 * D * max(C, 1) * 4                   # w2
        + block_n * D * 4                         # h (f32) intermediate
        + 2 * C * block_n * 4                     # output tiles (double-buffered)
    )
    vmem_limit = int(min(max(buf_bytes * 2, 16 * 1024 * 1024), 64 * 1024 * 1024))

    # ---- Kernel call --------------------------------------------------------------
    out_t = pl.pallas_call(
        _make_attn_net_kernel(single_logit, compute_dtype),
        out_shape=jax.ShapeDtypeStruct((C, N), jnp.float32),   # transposed (lane-dense)
        grid=(grid_n,),
        in_specs=[
            pl.BlockSpec((block_n, L), lambda i: (i, 0)),      # x: tiled over rows
            _resident_spec((L, D)),                            # w1: resident
            _resident_spec((1, D)),                            # b1: resident
            w2_spec,                                           # w2: resident
            b2_spec,                                           # b2: resident / SMEM scalar
        ],
        out_specs=pl.BlockSpec((C, block_n), lambda i: (0, i)),
        compiler_params=pltpu.CompilerParams(
            dimension_semantics=("parallel",),
            vmem_limit_bytes=vmem_limit,
        ),
        interpret=interpret,
    )(x, w1_c, b1, w2_arg, b2_arg)

    A = out_t.T                                                # (N, C)
    return A, x


def init_params(key, L=1024, D=256, n_classes=1):
    """Weights stored transposed as (in_features, out_features)."""
    k1, k2, k3, k4 = jax.random.split(key, 4)

    def xavier(k, fan_in, fan_out):
        std = (2.0 / (fan_in + fan_out)) ** 0.5
        return std * jax.random.normal(k, (fan_in, fan_out), dtype=jnp.float32)

    return {
        "w1": xavier(k1, L, D),                                            # Linear(L, D)
        "b1": 0.02 * jax.random.normal(k2, (1, D), dtype=jnp.float32),
        "w2": xavier(k3, D, n_classes),                                    # Linear(D, C)
        "b2": 0.02 * jax.random.normal(k4, (1, n_classes), dtype=jnp.float32),
    }


def attn_net_reference(params, x, compute_dtype=jnp.bfloat16):
    """Pure-JAX reference using the same dtype choices as the kernel."""
    h = jnp.dot(x.astype(compute_dtype), params["w1"].astype(compute_dtype),
                preferred_element_type=jnp.float32) + params["b1"]
    h = jnp.tanh(h)
    w2 = params["w2"].astype(jnp.float32)
    b2 = params["b2"].astype(jnp.float32)
    if w2.shape[1] == 1:
        a = jnp.sum(h * w2.T, axis=-1, keepdims=True) + b2[0, 0]
    else:
        a = jnp.dot(h, w2, preferred_element_type=jnp.float32) + b2
    return a, x


def attn_net_reference_f32(params, x):
    """True f32 module semantics (what the PyTorch Attn_Net computes)."""
    h = jnp.tanh(jnp.dot(x, params["w1"],
                         precision=jax.lax.Precision.HIGHEST) + params["b1"])
    a = jnp.dot(h, params["w2"],
                precision=jax.lax.Precision.HIGHEST) + params["b2"]
    return a, x


if __name__ == "__main__":
    key = jax.random.PRNGKey(0)
    k_p1, k_p2, k_x = jax.random.split(key, 3)

    # Small-but-representative shapes: N=200 patches (not a multiple of the tile,
    # exercises the partial edge block and a 2-step grid), L=256 features, D=128.
    N, L, D = 200, 256, 128
    x = jax.random.normal(k_x, (N, L), dtype=jnp.float32)

    # Default Attn_Net config: n_classes=1 (lane-reduction + SMEM-bias path).
    params = init_params(k_p1, L=L, D=D, n_classes=1)
    A, x_out = attn_net_forward(params, x)
    jax.block_until_ready((A, x_out))
    A_ref, _ = attn_net_reference(params, x)
    A_f32, _ = attn_net_reference_f32(params, x)
    assert A.shape == (N, 1)
    assert jnp.allclose(A, A_ref, atol=2e-3, rtol=2e-3), float(
        jnp.max(jnp.abs(A - A_ref)))
    # Drift vs the true f32 module (bf16 layer-1 operands) stays small.
    assert jnp.allclose(A, A_f32, atol=5e-2, rtol=5e-2), float(
        jnp.max(jnp.abs(A - A_f32)))
    assert jnp.array_equal(x_out, x)

    # n_classes=4 exercises the general (D, C) matmul + lane-dense transpose path.
    params4 = init_params(k_p2, L=L, D=D, n_classes=4)
    A4, _ = attn_net_forward(params4, x)
    jax.block_until_ready(A4)
    A4_ref, _ = attn_net_reference(params4, x)
    A4_f32, _ = attn_net_reference_f32(params4, x)
    assert A4.shape == (N, 4)
    assert jnp.allclose(A4, A4_ref, atol=2e-3, rtol=2e-3), float(
        jnp.max(jnp.abs(A4 - A4_ref)))
    assert jnp.allclose(A4, A4_f32, atol=5e-2, rtol=5e-2), float(
        jnp.max(jnp.abs(A4 - A4_f32)))

    print("KERNEL_OK")
</pallas_src>

<mosaic_0001>
module attributes {stable_mosaic.version = 11 : i64} {
  func.func @kernel(%arg0: i32, %arg1: memref<128x256xf32, #tpu.memory_space<vmem>>, %arg2: memref<256x128xbf16, #tpu.memory_space<vmem>>, %arg3: memref<1x128xf32, #tpu.memory_space<vmem>>, %arg4: memref<1x128xf32, #tpu.memory_space<vmem>>, %arg5: memref<1x1xf32, #tpu.memory_space<smem>>, %arg6: memref<1x128xf32, #tpu.memory_space<vmem>>) attributes {dimension_semantics = [#tpu.dimension_semantics<parallel>], iteration_bounds = array<i64: 2>, scalar_prefetch = 0 : i64, scratch_operands = 0 : i64, tpu.core_type = #tpu.core_type<tc>, window_params = [{transform_indices = @transform_0, window_bounds = array<i64: 128, 256>}, {pipeline_mode = #tpu.pipeline_mode<synchronous>, transform_indices = @transform_1, window_bounds = array<i64: 256, 128>}, {pipeline_mode = #tpu.pipeline_mode<synchronous>, transform_indices = @transform_2, window_bounds = array<i64: 1, 128>}, {pipeline_mode = #tpu.pipeline_mode<synchronous>, transform_indices = @transform_3, window_bounds = array<i64: 1, 128>}, {transform_indices = @transform_4, window_bounds = array<i64: 1, 1>}, {transform_indices = @transform_5, window_bounds = array<i64: 1, 128>}]} {
    %c0 = arith.constant 0 : index
    %c0_0 = arith.constant 0 : index
    %0 = vector.load %arg1[%c0, %c0_0] : memref<128x256xf32, #tpu.memory_space<vmem>>, vector<128x256xf32>
    %1 = arith.truncf %0 : vector<128x256xf32> to vector<128x256xbf16>
    %c0_1 = arith.constant 0 : index
    %c0_2 = arith.constant 0 : index
    %2 = vector.load %arg2[%c0_1, %c0_2] : memref<256x128xbf16, #tpu.memory_space<vmem>>, vector<256x128xbf16>
    %cst = arith.constant dense<0.000000e+00> : vector<128x128xf32>
    %3 = tpu.matmul %1, %2, %cst {dimension_numbers = #tpu.dot_dimension_numbers<[1], [0], [0], [1], [0, 0, 1, 1], [], []>} : vector<128x256xbf16>, vector<256x128xbf16>, vector<128x128xf32> -> vector<128x128xf32>
    %c0_3 = arith.constant 0 : index
    %c0_4 = arith.constant 0 : index
    %4 = vector.load %arg3[%c0_3, %c0_4] : memref<1x128xf32, #tpu.memory_space<vmem>>, vector<1x128xf32>
    %5 = vector.broadcast %4 : vector<1x128xf32> to vector<128x128xf32>
    %6 = arith.addf %3, %5 : vector<128x128xf32>
    %7 = math.tanh %6 : vector<128x128xf32>
    %c0_5 = arith.constant 0 : index
    %c0_6 = arith.constant 0 : index
    %8 = vector.load %arg4[%c0_5, %c0_6] : memref<1x128xf32, #tpu.memory_space<vmem>>, vector<1x128xf32>
    %9 = vector.broadcast %8 : vector<1x128xf32> to vector<128x128xf32>
    %10 = arith.mulf %7, %9 : vector<128x128xf32>
    %cst_7 = arith.constant dense<0.000000e+00> : vector<128xf32>
    %11 = vector.multi_reduction <add>, %10, %cst_7 [1] : vector<128x128xf32> to vector<128xf32>
    %12 = vector.shape_cast %11 : vector<128xf32> to vector<128x1xf32>
    %c0_8 = arith.constant 0 : index
    %c0_9 = arith.constant 0 : index
    %13 = memref.load %arg5[%c0_8, %c0_9] : memref<1x1xf32, #tpu.memory_space<smem>>
    %14 = vector.broadcast %13 : f32 to vector<128x1xf32>
    %15 = arith.addf %12, %14 : vector<128x1xf32>
    %16 = tpu.transpose %15, [1, 0] : vector<128x1xf32> -> vector<1x128xf32>
    %c0_10 = arith.constant 0 : index
    %c0_11 = arith.constant 0 : index
    %17 = vector.load %arg6[%c0_10, %c0_11] : memref<1x128xf32, #tpu.memory_space<vmem>>, vector<1x128xf32>
    tpu.vector_store %arg6[%c0_10, %c0_11], %16 {strides = array<i32>} : memref<1x128xf32, #tpu.memory_space<vmem>>, vector<1x128xf32>,
    return
  }
  func.func @transform_0(%arg0: i32) -> (i32, i32) {
    %c0_i32 = arith.constant 0 : i32
    %c0_i32_0 = arith.constant 0 : i32
    return %arg0, %c0_i32 : i32, i32
  }
  func.func @transform_1(%arg0: i32) -> (i32, i32) {
    %c0_i32 = arith.constant 0 : i32
    %c0_i32_0 = arith.constant 0 : i32
    %c0_i32_1 = arith.constant 0 : i32
    return %c0_i32, %c0_i32_0 : i32, i32
  }
  func.func @transform_2(%arg0: i32) -> (i32, i32) {
    %c0_i32 = arith.constant 0 : i32
    %c0_i32_0 = arith.constant 0 : i32
    %c0_i32_1 = arith.constant 0 : i32
    return %c0_i32, %c0_i32_0 : i32, i32
  }
  func.func @transform_3(%arg0: i32) -> (i32, i32) {
    %c0_i32 = arith.constant 0 : i32
    %c0_i32_0 = arith.constant 0 : i32
    %c0_i32_1 = arith.constant 0 : i32
    return %c0_i32, %c0_i32_0 : i32, i32
  }
  func.func @transform_4(%arg0: i32) -> (i32, i32) {
    %c0_i32 = arith.constant 0 : i32
    %c0_i32_0 = arith.constant 0 : i32
    %c0_i32_1 = arith.constant 0 : i32
    return %c0_i32, %c0_i32_0 : i32, i32
  }
  func.func @transform_5(%arg0: i32) -> (i32, i32) {
    %c0_i32 = arith.constant 0 : i32
    %c0_i32_0 = arith.constant 0 : i32
    return %c0_i32, %arg0 : i32, i32
  }
}

</mosaic_0001>

<bundles_post_ra>
// kernel: tpu_custom_call.1
= control target key start
LH: loop header
LB: loop body
LE: loop exit
PB: predicated region body
PF: predicated region fallthrough
CT: control target
= control target key end

     0   :  { %s1401_s0 = inlined_call_operand.hbm [shape: f32[200,256], index: 0, kind: input, shape index: {}]   ;;  %s1402_s1 = inlined_call_operand.hbm [shape: bf16[256,128], index: 1, kind: input, shape index: {}]   ;;  %s1403_s2 = inlined_call_operand.vmem [shape: f32[1,128], index: 2, kind: input, shape index: {}]   ;;  %s1404_s3 = inlined_call_operand.vmem [shape: f32[1,128], index: 3, kind: input, shape index: {}]   ;;  %s1405_s4 = inlined_call_operand.<no memory space> [shape: f32[1,1], index: 4, kind: input, shape index: {}]   ;;  %s1406_s5 = inlined_call_operand.hbm [shape: f32[1,200], index: 5, kind: output, shape index: {}]  }
   0x1   :  { %10 = sst [smem:[#allocation2]] %s1405_s4 }
   0x2   :  { %11 = vsyncpa [#allocation4], 0 }
   0x3   :  { %13 = vsyncpa [#allocation4 + $0x1], 0 }
   0x4   :  { %14 = vsyncpa [#allocation7], 0 }
   0x5   :  { %15 = vsyncpa [#allocation5], 0 }
   0x6   :  { %17 = vsyncpa [#allocation5 + $0x1], 0  ;;  %s1149_s20 = smov 0   ;;  %s1151_s21 = smov 0  }
   0x7   :  { %s1153_s22 = smov 0   ;;  %s1155_s23 = smov 0  }
   0x8 LB: > { %s1170_s4 = sadd.s32 4294967295, %s1108_s23   ;;  %s763_s24 = sadd.s32 4294967294, %s1108_s23   ;;  %s1108_s23 = sphi %s1155_s23, %s1424_s23   ;;  %s1104_s22 = sphi %s1153_s22, %s1423_s22   ;;  %s1100_s21 = sphi %s1151_s21, %s1422_s21   ;;  %s1096_s20 = sphi %s1149_s20, %s1421_s20  }
   0x9   : > { %s1174_s25 = sadd.s32 1, %s1108_s23   ;;  %s30_s26 = sadd.s32 1, %s1104_s22 }
   0xa   : > { %s27_s27 = ssub.s32 %s1108_s23, %s1174_s25  ;;  %p37_p0 = scmp.ne.s32.totalorder %s1104_s22, %s1100_s21 }
   0xb   : > { %p28_p1 = scmp.eq.s32.totalorder %s27_s27, 0  ;;  %p38_p2 = scmp.eq.s32.totalorder %s1108_s23, 0 }
   0xc   : > { %p43_p3 = scmp.ne.s32.totalorder %s1100_s21, %s1096_s20  ;;  %p1409_p4 = scmp.eq.s32.totalorder %s1170_s4, 0 }
   0xd   : > { %s1186_s28 = scalar_select %p28_p1, %s1104_s22, %s30_s26  }
   0xe   : > { %p1188_p5 = por %p38_p2, %p37_p0  ;;  %p1194_p6 = por %p1409_p4, %p43_p3 }
   0xf   : > { %p151_p7 = scmp.eq.s32.totalorder %s1170_s4, 1  ;;  %p157_p8 = scmp.eq.s32.totalorder %s763_s24, 1 }
  0x10   : > { %p764_p9 = scmp.ge.s32.totalorder %s1108_s23, 1  ;;  %p164_p10 = scmp.lt.s32.totalorder %s1108_s23, 3 }
  0x11   : > { %p1201_p11 = por %p151_p7, %p37_p0  ;;  %p1205_p12 = por %p157_p8, %p43_p3 }
  0x12   : > { %p1209_p13 = pnand %p764_p9, %p164_p10  ;;  %s175_s11 = sshll.u32 %s1402_s1, 4  ;;  %s176_s11 = int_to_ptr.hbm [resolvable:$true] %s175_s11 }
  0x13   : > { %s1413_s7 = scalar_select %p1205_p12, 1, 0 }
  0x14   : > { %p887_p1 = pneg %p1209_p13  ;;  %s1110_s12 = smov [#allocation6]  }
  0x15   : > { %s177_s13 = sshll.u32 %s1110_s12, 4  ;;  %s1111_s14 = smov 64   ;;  %s178_s13 = int_to_ptr.vmem [resolvable:$true] %s177_s13 }
  0x16   : > { %p888_p0 = pnand %p887_p1, %p1409_p4  ;;  %s1112_s15 = smov 4  }
  0x17   : > { %p1408_p2 = scmp.ge.s32.totalorder %s1108_s23, 2 }
  0x18   : > { %890 = dma.hbm_to_vmem [thread:$0]  (!%p888_p0), %s176_s11, 2048, %s178_s13, [#allocation7], %s1111_s14, %s1111_s14, %s1112_s15  }
  0x19   : > { %196 = sbr.rel (%p1408_p2) target bundleno = 67 (0x43), region = 32 }
  0x1e   : > { %199 = sbr.rel (!%p1188_p5) target bundleno = 67 (0x43), region = 36  ;;  %s200_s16 = sand.u32 (%p1188_p5), 1, %s1104_s22  }
  0x1f   : > { %s768_s17 = sshll.u32 (%p1188_p5), %s1108_s23, 4  ;;  %s767_s18 = sshll.u32 (%p1188_p5), %s200_s16, 8 }
  0x20   : > { %s206_s19 = ssub.s32 (%p1188_p5), 25, %s768_s17  ;;  %s1230_s9 = scalar_lea.sflag (%p1188_p5), [#allocation4], %s200_s16 }
  0x21   : > { %p207_p3 = scmp.lt.s32.totalorder (%p1188_p5), %s206_s19, 16  ;;  %s204_s10 = scalar_lea.vmem (%p1188_p5), [#allocation3], %s767_s18 }
  0x23   : > { %s1426_s19 = smov (!%p207_p3, %s206_s19), 16 }
  0x24   : > { %s845_s24 = sshll.u32 %s1426_s19, 4 }
  0x25   : > { %s211_s26 = ssub.s32 256, %s845_s24 }
  0x26   : > { %s212_s27 = sshll.u32 %s211_s26, 4 }
  0x27   : > { %213 = vsyncadd %s1230_s9, %s212_s27  ;;  %p1233_p5 = scmp.ne.s32.totalorder %s845_s24, 0  ;;  %s847_s11 = sshll.u32 %s1108_s23, 8 }
  0x28   : > { %s217_s14 = scalar_lea.hbm %s1401_s0, %s847_s11  ;;  %s1241_s15 = sshll.u32 %s204_s10, 4  ;;  %s222_s15 = int_to_ptr.vmem [resolvable:$true] %s1241_s15 }
  0x29   : > { %s219_s16 = sshll.u32 %s217_s14, 4  ;;  %s1407_s17 = sshll.u32 %s1426_s19, 8  ;;  %s1244_s16 = int_to_ptr.hbm [resolvable:$true] %s219_s16 }
  0x2a   : > { %s999_s18 = sshra.s32 %s1244_s16, 4  ;;  %s1001_s24 = sshrl.u32 %s1407_s17, 4  ;;  %s1000_s18 = int_to_ptr.hbm [resolvable:$true] %s999_s18 }
  0x2b   : > { %s1006_s26 = scalar_lea.hbm %s1000_s18, %s1001_s24  ;;  %s1010_s10 = scalar_lea.hbm %s1401_s0, 400 }
  0x2c   : > { %p1007_p7 = scmp.ne.s32.totalorder %s1000_s18, %s1006_s26  ;;  %p1011_p10 = scmp.lt.s32.totalorder %s1000_s18, %s1401_s0 }
  0x2d   : > { %p1012_p1 = scmp.lt.s32.totalorder %s1010_s10, %s1006_s26 }
  0x2e   : > { %p1008_p8 = pnand %p1007_p7, %p1233_p5 }
  0x2f   : > { %p1013_p0 = por %p1012_p1, %p1011_p10 }
  0x30   : > { %p1009_p9 = pneg %p1008_p8 }
  0x32   : > { %p1014_p3 = pnand %p1013_p0, %p1009_p9 }
  0x34   : > { %1017 = shalt.err (!%p1014_p3)
}
  0x35   : > { %s1018_s14 = sshra.s32 %s222_s15, 4  ;;  %s1113_s27 = smov [#allocation3]   ;;  %s1019_s14 = int_to_ptr.vmem [resolvable:$true] %s1018_s14 }
  0x36   : > { %s1025_s17 = scalar_lea.vmem %s1019_s14, %s1001_s24  ;;  %s1029_s11 = scalar_lea.vmem %s1113_s27, 512 }
  0x37   : > { %p1026_p7 = scmp.ne.s32.totalorder %s1019_s14, %s1025_s17  ;;  %p1031_p4 = scmp.lt.s32.totalorder %s1029_s11, %s1025_s17 }
  0x39   : > { %p1027_p8 = pnand %p1026_p7, %p1233_p5 }
  0x3b   : > { %p1028_p2 = pneg %p1027_p8 }
  0x3d   : > { %p1033_p12 = pnand %p1031_p4, %p1028_p2 }
  0x3f   : > { %1036 = shalt.err (!%p1033_p12)
}
  0x40   : > { %s1114_s18 = smov 256   ;;  %s1115_s26 = smov 16  }
  0x41   : > { %s1416_s10 = sshll.u32 %s1426_s19, 8 }
  0x42   : > { %227 = dma.hbm_to_vmem [thread:$0]  (%p1233_p5), %s1244_s16, %s1416_s10, %s222_s15, %s1230_s9, %s1114_s18, %s1114_s18, %s1115_s26  }
  0x43 PF: > { %233 = sbr.rel (%p1209_p13) target bundleno = 533 (0x215), region = 40  ;;  %s1273_s17 = sand.u32 (!%p1209_p13), 1, %s1100_s21  }
  0x44   : > { %s777_s24 = sshll.u32 (!%p1209_p13), %s1273_s17, 8  ;;  %s236_s12 = scalar_lea.sflag (!%p1209_p13), [#allocation4], %s1273_s17 }
  0x45   : > { %s1277_s13 = scalar_lea.vmem (!%p1209_p13), [#allocation3], %s777_s24 }
  0x48   : > { %1083 = dma.done.wait (%p1194_p6), %s236_s12, 4096  }
  0x49   : > { %1085 = vsyncadd (%p1194_p6), %s236_s12, 4294963200  ;;  %p1417_p4 = scmp.eq.s32.totalorder %s1170_s4, 0 }
  0x4b   : > { %1087 = dma.done.wait (%p1417_p4), [#allocation7], 2048   ;;  %p1418_p12 = pmov %p1417_p4 }
  0x4c   : > { %v855_v0 = vld [vmem:[#allocation6 + $0x38] sm:$0xff]  ;;  %v854_v2 = vld [vmem:[#allocation6 + $0x30] sm:$0xff]  ;;  %v853_v4 = vld [vmem:[#allocation6 + $0x28] sm:$0xff]  ;;  %s623_s29 = sld [smem:[#allocation2]]  ;;  %s683_s14 = scalar_lea.hbm %s1406_s5, %s1170_s4 }
  0x4d   : > { %1089 = vsyncadd (%p1418_p12), [#allocation7], 4294965248  ;;  %v863_v1 = vld [vmem:[#allocation6 + $0x78] sm:$0xff]  ;;  %457 = vmatpush.bf16.msra.mxu0 %v855_v0  ;;  %864 = vmatpush.bf16.msra.mxu2 %v855_v0  ;;  %v862_v3 = vld [vmem:[#allocation6 + $0x70] sm:$0xff]  ;;  %s270_s27 = scalar_lea.vmem [#allocation8], %s1273_s17  ;;  %s687_s18 = sshll.u32 %s683_s14, 4  ;;  %s688_s18 = int_to_ptr.hbm [resolvable:$true] %s687_s18 }
  0x4e   : > { %506 = vmatpush.bf16.msra.mxu1 %v863_v1  ;;  %872 = vmatpush.bf16.msra.mxu3 %v863_v1  ;;  %v861_v5 = vld [vmem:[#allocation6 + $0x68] sm:$0xff]  ;;  %v852_v6 = vld [vmem:[#allocation6 + $0x20] sm:$0xff]  ;;  %v851_v8 = vld [vmem:[#allocation6 + $0x18] sm:$0xff]  ;;  %s685_s11 = sshll.u32 %s270_s27, 4  ;;  %s675_s26 = scalar_lea.sflag [#allocation5], %s1273_s17  ;;  %s686_s11 = int_to_ptr.vmem [resolvable:$true] %s685_s11 }
  0x4f   : > { %v860_v7 = vld [vmem:[#allocation6 + $0x60] sm:$0xff]  ;;  %v859_v9 = vld [vmem:[#allocation6 + $0x58] sm:$0xff]  ;;  %v850_v10 = vld [vmem:[#allocation6 + $0x10] sm:$0xff]  ;;  %s1052_s10 = sshra.s32 %s688_s18, 4  ;;  %s1058_s30 = scalar_lea.hbm %s1406_s5, 2  ;;  %s1053_s10 = int_to_ptr.hbm [resolvable:$true] %s1052_s10 }
  0x50   : > { %v858_v11 = vld [vmem:[#allocation6 + $0x50] sm:$0xff]  ;;  %v849_v12 = vld [vmem:[#allocation6 + $0x8] sm:$0xff]  ;;  %v848_v14 = vld [vmem:[#allocation6] sm:$0xff]  ;;  %s1054_s24 = scalar_lea.hbm %s1053_s10, 1  ;;  %p1059_p5 = scmp.lt.s32.totalorder %s1053_s10, %s1406_s5 }
  0x51   : > { %458 = vmatpush.bf16.msra.mxu0 %v854_v2  ;;  %865 = vmatpush.bf16.msra.mxu2 %v854_v2  ;;  %v857_v13 = vld [vmem:[#allocation6 + $0x48] sm:$0xff]  ;;  %v856_v15 = vld [vmem:[#allocation6 + $0x40] sm:$0xff]  ;;  %v279_v17 = vld [vmem:[%s1277_s13 + $0x10] sm:$0xff]  ;;  %p1055_p6 = scmp.ne.s32.totalorder %s1053_s10, %s1054_s24  ;;  %p1060_p9 = scmp.lt.s32.totalorder %s1058_s30, %s1054_s24 }
  0x52   : > { %507 = vmatpush.bf16.msra.mxu1 %v862_v3  ;;  %873 = vmatpush.bf16.msra.mxu3 %v862_v3  ;;  %v277_v16 = vld [vmem:[%s1277_s13] sm:$0xff]  ;;  %v295_v19 = vld [vmem:[%s1277_s13 + $0x90] sm:$0xff]  ;;  %v278_v20 = vld [vmem:[%s1277_s13 + $0x8] sm:$0xff] }
  0x53   : > { %v293_v18 = vld [vmem:[%s1277_s13 + $0x80] sm:$0xff]  ;;  %v280_v21 = vld [vmem:[%s1277_s13 + $0x18] sm:$0xff]  ;;  %v294_v22 = vld [vmem:[%s1277_s13 + $0x88] sm:$0xff]  ;;  %v309_v24 = vpack.c.bf16 %v279_v17, %v277_v16  ;;  %p1056_p13 = pnand %p1055_p6, %p1201_p11  ;;  %p1061_p10 = por %p1060_p9, %p1059_p5 }
  0x54   : > { %v296_v23 = vld [vmem:[%s1277_s13 + $0x98] sm:$0xff]  ;;  %v317_v25 = vpack.c.bf16 %v295_v19, %v293_v18  ;;  %v310_v26 = vpack.c.bf16 %v280_v21, %v278_v20  ;;  %v281_v28 = vld [vmem:[%s1277_s13 + $0x20] sm:$0xff]  ;;  %v283_v29 = vld [vmem:[%s1277_s13 + $0x30] sm:$0xff] }
  0x55   : > { %459 = vmatpush.bf16.msra.mxu0 %v853_v4  ;;  %866 = vmatpush.bf16.msra.mxu2 %v853_v4  ;;  %v318_v27 = vpack.c.bf16 %v296_v23, %v294_v22  ;;  %v297_v30 = vld [vmem:[%s1277_s13 + $0xa0] sm:$0xff]  ;;  %v299_v31 = vld [vmem:[%s1277_s13 + $0xb0] sm:$0xff]  ;;  %v282_v32 = vld [vmem:[%s1277_s13 + $0x28] sm:$0xff]  ;;  %v311_v36 = vpack.c.bf16 %v283_v29, %v281_v28  ;;  %p1057_p2 = pneg %p1056_p13 }
  0x56   : > { %508 = vmatpush.bf16.msra.mxu1 %v861_v5  ;;  %874 = vmatpush.bf16.msra.mxu3 %v861_v5  ;;  %v284_v33 = vld [vmem:[%s1277_s13 + $0x38] sm:$0xff]  ;;  %v298_v34 = vld [vmem:[%s1277_s13 + $0xa8] sm:$0xff]  ;;  %v319_v37 = vpack.c.bf16 %v299_v31, %v297_v30  ;;  %v285_v40 = vld [vmem:[%s1277_s13 + $0x40] sm:$0xff] }
  0x57   : > { %v300_v35 = vld [vmem:[%s1277_s13 + $0xb8] sm:$0xff]  ;;  %v312_v38 = vpack.c.bf16 %v284_v33, %v282_v32  ;;  %v287_v41 = vld [vmem:[%s1277_s13 + $0x50] sm:$0xff]  ;;  %v301_v42 = vld [vmem:[%s1277_s13 + $0xc0] sm:$0xff]  ;;  %p1062_p1 = pnand %p1061_p10, %p1057_p2 }
  0x58   : > { %v320_v39 = vpack.c.bf16 %v300_v35, %v298_v34  ;;  %v303_v43 = vld [vmem:[%s1277_s13 + $0xd0] sm:$0xff]  ;;  %v286_v44 = vld [vmem:[%s1277_s13 + $0x48] sm:$0xff]  ;;  %v288_v45 = vld [vmem:[%s1277_s13 + $0x58] sm:$0xff]  ;;  %v313_v48 = vpack.c.bf16 %v287_v41, %v285_v40 }
  0x59   : > { %460 = vmatpush.bf16.msra.mxu0 %v852_v6  ;;  %867 = vmatpush.bf16.msra.mxu2 %v852_v6  ;;  %v302_v46 = vld [vmem:[%s1277_s13 + $0xc8] sm:$0xff]  ;;  %v304_v47 = vld [vmem:[%s1277_s13 + $0xd8] sm:$0xff]  ;;  %v321_v49 = vpack.c.bf16 %v303_v43, %v301_v42  ;;  %v314_v50 = vpack.c.bf16 %v288_v45, %v286_v44  ;;  %v289_v52 = vld [vmem:[%s1277_s13 + $0x60] sm:$0xff] }
  0x5a   : > { %509 = vmatpush.bf16.msra.mxu1 %v860_v7  ;;  %875 = vmatpush.bf16.msra.mxu3 %v860_v7  ;;  %v322_v51 = vpack.c.bf16 %v304_v47, %v302_v46  ;;  %v291_v53 = vld [vmem:[%s1277_s13 + $0x70] sm:$0xff]  ;;  %v290_v54 = vld [vmem:[%s1277_s13 + $0x68] sm:$0xff]  ;;  %v305_v55 = vld [vmem:[%s1277_s13 + $0xe0] sm:$0xff] }
  0x5b   : > { %v307_v56 = vld [vmem:[%s1277_s13 + $0xf0] sm:$0xff]  ;;  %v292_v57 = vld [vmem:[%s1277_s13 + $0x78] sm:$0xff]  ;;  %v306_v58 = vld [vmem:[%s1277_s13 + $0xe8] sm:$0xff]  ;;  %v315_v60 = vpack.c.bf16 %v291_v53, %v289_v52 }
  0x5c   : > { %v308_v59 = vld [vmem:[%s1277_s13 + $0xf8] sm:$0xff]  ;;  %v323_v61 = vpack.c.bf16 %v307_v56, %v305_v55  ;;  %v316_v62 = vpack.c.bf16 %v292_v57, %v290_v54  ;;  %v1322_v0 = vld [vmem:[%s1403_s2] ss:$0 sm:$0xff] }
  0x5d   : > { %461 = vmatpush.bf16.msra.mxu0 %v851_v8  ;;  %868 = vmatpush.bf16.msra.mxu2 %v851_v8  ;;  %v324_v63 = vpack.c.bf16 %v308_v59, %v306_v58  ;;  %v1328_v8 = vld [vmem:[%s1404_s3] ss:$0 sm:$0xff] }
  0x5e   : > { %510 = vmatpush.bf16.msra.mxu1 %v859_v9  ;;  %876 = vmatpush.bf16.msra.mxu3 %v859_v9 }
  0x61   : > { %462 = vmatpush.bf16.msra.mxu0 %v850_v10  ;;  %869 = vmatpush.bf16.msra.mxu2 %v850_v10 }
  0x62   : > { %511 = vmatpush.bf16.msra.mxu1 %v858_v11  ;;  %877 = vmatpush.bf16.msra.mxu3 %v858_v11 }
  0x65   : > { %463 = vmatpush.bf16.msra.mxu0 %v849_v12  ;;  %870 = vmatpush.bf16.msra.mxu2 %v849_v12 }
  0x66   : > { %512 = vmatpush.bf16.msra.mxu1 %v857_v13  ;;  %878 = vmatpush.bf16.msra.mxu3 %v857_v13 }
  0x69   : > { %464 = vmatpush.bf16.msra.mxu0 %v848_v14  ;;  %871 = vmatpush.bf16.msra.mxu2 %v848_v14 }
  0x6a   : > { %513 = vmatpush.bf16.msra.mxu1 %v856_v15  ;;  %879 = vmatpush.bf16.msra.mxu3 %v856_v15 }
  0x6c   : > { %465 = vmatmul.bf16.vlgmr.msra.gmra.mxu0 %v309_v24  ;;  %485 = vmatmul.bf16.vlgmr.msra.gmra.mxu2 %v317_v25 }
  0x6d   : > { %514 = vmatmul.bf16.vlgmr.msra.gmra.mxu1 %v310_v26  ;;  %534 = vmatmul.bf16.vlgmr.msra.gmra.mxu3 %v318_v27 }
  0x7c   : > { %470 = vmatmul.bf16.gmra.mxu0 %v311_v36  ;;  %490 = vmatmul.bf16.gmra.mxu2 %v319_v37 }
  0x7d   : > { %519 = vmatmul.bf16.gmra.mxu1 %v312_v38  ;;  %539 = vmatmul.bf16.gmra.mxu3 %v320_v39 }
  0x8c   : > { %475 = vmatmul.bf16.gmra.mxu0 %v313_v48  ;;  %495 = vmatmul.bf16.gmra.mxu2 %v321_v49 }
  0x8d   : > { %524 = vmatmul.bf16.gmra.mxu1 %v314_v50  ;;  %544 = vmatmul.bf16.gmra.mxu3 %v322_v51 }
  0x9c   : > { %480 = vmatmul.bf16.gmra.mxu0 %v315_v60  ;;  %500 = vmatmul.bf16.gmra.mxu2 %v323_v61 }
  0x9d   : > { %529 = vmatmul.bf16.gmra.mxu1 %v316_v62  ;;  %549 = vmatmul.bf16.gmra.mxu3 %v324_v63 }
  0xe9   : > { %v466_v1 = vpop.f32.mrf.mxu0 }
  0xea   : > { %v467_v2 = vadd.f32 %v1322_v0, %v466_v1  ;;  %v515_v3 = vpop.f32.mrf.mxu1 }
  0xec   : > { %v516_v4 = vadd.f32 %v515_v3, %v467_v2 }
  0xee   : > { %937 = vtanh.f32 %v516_v4 }
  0xef   : > { %v486_v5 = vpop.f32.mrf.mxu2 }
  0xf0   : > { %v535_v6 = vpop.f32.mrf.mxu3  ;;  %v487_v48 = vadd.f32 %v1322_v0, %v486_v5 }
  0xf1   : > { %v468_v7 = vpop.f32.mrf.mxu0 }
  0xf2   : > { %v469_v9 = vadd.f32 %v1322_v0, %v468_v7  ;;  %v517_v10 = vpop.f32.mrf.mxu1  ;;  %v536_v53 = vadd.f32 %v535_v6, %v487_v48 }
  0xf4   : > { %v938_v11 = vpop.eup %937  ;;  %v518_v12 = vadd.f32 %v517_v10, %v469_v9 }
  0xf5   : > { %v575_v13 = vmul.f32 %v938_v11, %v1328_v8 }
  0xf6   : > { %939 = vtanh.f32 %v518_v12 }
  0xf7   : > { %v1332_v14 = vpop.f32.mrf.mxu2  ;;  %591 = vadd.xlane.f32.xlu0 %v575_v13 }
  0xf8   : > { %v1334_v15 = vpop.f32.mrf.mxu3  ;;  %v489_v3 = vadd.f32 %v1322_v0, %v1332_v14 }
  0xf9   : > { %v471_v16 = vpop.f32.mrf.mxu0 }
  0xfa   : > { %v472_v17 = vadd.f32 %v1322_v0, %v471_v16  ;;  %v520_v18 = vpop.f32.mrf.mxu1  ;;  %v538_v11 = vadd.f32 %v1334_v15, %v489_v3 }
  0xfc   : > { %v940_v19 = vpop.eup %939  ;;  %v521_v20 = vadd.f32 %v520_v18, %v472_v17 }
  0xfd   : > { %v576_v21 = vmul.f32 %v940_v19, %v1328_v8 }
  0xfe   : > { %941 = vtanh.f32 %v521_v20 }
  0xff   : > { %v491_v22 = vpop.f32.mrf.mxu2  ;;  %593 = vadd.xlane.f32.xlu0 %v576_v21 }
 0x100   : > { %v540_v23 = vpop.f32.mrf.mxu3  ;;  %v492_v28 = vadd.f32 %v1322_v0, %v491_v22 }
 0x101   : > { %v473_v24 = vpop.f32.mrf.mxu0 }
 0x102   : > { %v474_v25 = vadd.f32 %v1322_v0, %v473_v24  ;;  %v522_v26 = vpop.f32.mrf.mxu1  ;;  %v541_v32 = vadd.f32 %v540_v23, %v492_v28 }
 0x104   : > { %v942_v27 = vpop.eup %941  ;;  %v523_v29 = vadd.f32 %v522_v26, %v474_v25 }
 0x105   : > { %v577_v30 = vmul.f32 %v942_v27, %v1328_v8 }
 0x106   : > { %943 = vtanh.f32 %v523_v29 }
 0x107   : > { %v493_v31 = vpop.f32.mrf.mxu2  ;;  %595 = vadd.xlane.f32.xlu1 %v577_v30  ;;  %945 = vtanh.f32 %v541_v32 }
 0x108   : > { %v542_v33 = vpop.f32.mrf.mxu3  ;;  %v494_v62 = vadd.f32 %v1322_v0, %v493_v31 }
 0x109   : > { %v476_v34 = vpop.f32.mrf.mxu0 }
 0x10a   : > { %v477_v35 = vadd.f32 %v1322_v0, %v476_v34  ;;  %v525_v36 = vpop.f32.mrf.mxu1  ;;  %v543_v5 = vadd.f32 %v542_v33, %v494_v62 }
 0x10c   : > { %v944_v37 = vpop.eup %943  ;;  %v526_v38 = vadd.f32 %v525_v36, %v477_v35  ;;  %v624_v35 = vstv %s623_s29 }
 0x10d   : > { %v578_v39 = vmul.f32 %v944_v37, %v1328_v8  ;;  %v946_v44 = vpop.eup %945 }
 0x10e   : > { %947 = vtanh.f32 %v526_v38  ;;  %v585_v52 = vmul.f32 %v946_v44, %v1328_v8 }
 0x10f   : > { %v496_v40 = vpop.f32.mrf.mxu2  ;;  %597 = vadd.xlane.f32.xlu1 %v578_v39 }
 0x110   : > { %v497_v41 = vadd.f32 %v1322_v0, %v496_v40  ;;  %v545_v42 = vpop.f32.mrf.mxu3 }
 0x111   : > { %v478_v43 = vpop.f32.mrf.mxu0 }
 0x112   : > { %v546_v45 = vadd.f32 %v545_v42, %v497_v41  ;;  %v479_v46 = vadd.f32 %v1322_v0, %v478_v43  ;;  %v527_v47 = vpop.f32.mrf.mxu1 }
 0x114   : > { %v948_v49 = vpop.eup %947  ;;  %949 = vtanh.f32 %v546_v45  ;;  %v528_v50 = vadd.f32 %v527_v47, %v479_v46 }
 0x115   : > { %v579_v51 = vmul.f32 %v948_v49, %v1328_v8 }
 0x116   : > { %951 = vtanh.f32 %v528_v50 }
 0x117   : > { %v498_v54 = vpop.f32.mrf.mxu2  ;;  %599 = vadd.xlane.f32.xlu2 %v579_v51  ;;  %611 = vadd.xlane.f32.xlu1 %v585_v52  ;;  %953 = vtanh.f32 %v536_v53 }
 0x118   : > { %v499_v55 = vadd.f32 %v1322_v0, %v498_v54  ;;  %v547_v56 = vpop.f32.mrf.mxu3 }
 0x119   : > { %v481_v57 = vpop.f32.mrf.mxu0 }
 0x11a   : > { %v950_v58 = vpop.eup %949  ;;  %v548_v59 = vadd.f32 %v547_v56, %v499_v55  ;;  %v482_v60 = vadd.f32 %v1322_v0, %v481_v57  ;;  %v530_v61 = vpop.f32.mrf.mxu1 }
 0x11b   : > { %v587_v63 = vmul.f32 %v950_v58, %v1328_v8 }
 0x11c   : > { %v952_v1 = vpop.eup %951  ;;  %955 = vtanh.f32 %v548_v59  ;;  %v531_v2 = vadd.f32 %v530_v61, %v482_v60 }
 0x11d   : > { %v580_v4 = vmul.f32 %v952_v1, %v1328_v8  ;;  %v954_v10 = vpop.eup %953 }
 0x11e   : > { %957 = vtanh.f32 %v531_v2  ;;  %v583_v21 = vmul.f32 %v954_v10, %v1328_v8 }
 0x11f   : > { %601 = vadd.xlane.f32.xlu2 %v580_v4  ;;  %v501_v6 = vpop.f32.mrf.mxu2  ;;  %959 = vtanh.f32 %v543_v5 }
 0x120   : > { %v502_v7 = vadd.f32 %v1322_v0, %v501_v6  ;;  %v550_v9 = vpop.f32.mrf.mxu3 }
 0x121   : > { %v483_v12 = vpop.f32.mrf.mxu0 }
 0x122   : > { %v956_v13 = vpop.eup %955  ;;  %v484_v16 = vadd.f32 %v1322_v0, %v483_v12  ;;  %v551_v17 = vadd.f32 %v550_v9, %v502_v7  ;;  %v532_v18 = vpop.f32.mrf.mxu1 }
 0x123   : > { %v588_v14 = vmul.f32 %v956_v13, %v1328_v8 }
 0x124   : > { %v958_v19 = vpop.eup %957  ;;  %v533_v20 = vadd.f32 %v532_v18, %v484_v16  ;;  %961 = vtanh.f32 %v551_v17 }
 0x125   : > { %963 = vtanh.f32 %v538_v11  ;;  %617 = vadd.xlane.f32.xlu1 %v588_v14  ;;  %v581_v22 = vmul.f32 %v958_v19, %v1328_v8  ;;  %v960_v25 = vpop.eup %959 }
 0x126   : > { %965 = vtanh.f32 %v533_v20  ;;  %v586_v31 = vmul.f32 %v960_v25, %v1328_v8 }
 0x127   : > { %607 = vadd.xlane.f32.xlu2 %v583_v21  ;;  %603 = vadd.xlane.f32.xlu0 %v581_v22  ;;  %v503_v15 = vpop.f32.mrf.mxu2 }
 0x128   : > { %v504_v23 = vadd.f32 %v1322_v0, %v503_v15  ;;  %v552_v24 = vpop.f32.mrf.mxu3 }
 0x12a   : > { %v962_v26 = vpop.eup %961  ;;  %v553_v27 = vadd.f32 %v552_v24, %v504_v23 }
 0x12b   : > { %v964_v28 = vpop.eup %963  ;;  %v589_v29 = vmul.f32 %v962_v26, %v1328_v8 }
 0x12c   : > { %v966_v30 = vpop.eup %965  ;;  %967 = vtanh.f32 %v553_v27  ;;  %v584_v33 = vmul.f32 %v964_v28, %v1328_v8 }
 0x12d   : > { %v582_v32 = vmul.f32 %v966_v30, %v1328_v8 }
 0x12f   : > { %613 = vadd.xlane.f32.xlu2 %v586_v31  ;;  %605 = vadd.xlane.f32.xlu1 %v582_v32 }
 0x130   : > { %609 = vadd.xlane.f32.xlu0 %v584_v33 }
 0x132   : > { %v968_v34 = vpop.eup %967 }
 0x133   : > { %v590_v0 = vmul.f32 %v968_v34, %v1328_v8 }
 0x137   : > { %619 = vadd.xlane.f32.xlu2 %v589_v29 }
 0x138   : > { %615 = vadd.xlane.f32.xlu0 %v587_v63 }
 0x140   : > { %621 = vadd.xlane.f32.xlu0 %v590_v0 }
 0x16a   : > { %v592_v36 = vpop.xlane.xlu0 %591 }
 0x16b   : > { %v625_v37 = vadd.f32 %v624_v35, %v592_v36 }
 0x16d   : > { %641 = vxpose.xlu1.b32.start [1/16] (narrow) %v625_v37, 8 }
 0x172   : > { %v594_v38 = vpop.xlane.xlu0 %593 }
 0x173   : > { %v626_v39 = vadd.f32 %v624_v35, %v594_v38 }
 0x175   : > { %642 = vxpose.xlu1.b32.cont [2/16] (narrow) %v626_v39, 8 }
 0x17a   : > { %v596_v40 = vpop.xlane.xlu1 %595 }
 0x17b   : > { %v627_v41 = vadd.f32 %v624_v35, %v596_v40 }
 0x17d   : > { %643 = vxpose.xlu1.b32.cont [3/16] (narrow) %v627_v41, 8 }
 0x182   : > { %v598_v42 = vpop.xlane.xlu1 %597 }
 0x183   : > { %v628_v43 = vadd.f32 %v624_v35, %v598_v42 }
 0x185   : > { %644 = vxpose.xlu1.b32.cont [4/16] (narrow) %v628_v43, 8 }
 0x18a   : > { %v600_v44 = vpop.xlane.xlu2 %599  ;;  %v612_v8 = vpop.xlane.xlu1 %611 }
 0x18b   : > { %v629_v45 = vadd.f32 %v624_v35, %v600_v44  ;;  %v635_v57 = vadd.f32 %v624_v35, %v612_v8 }
 0x18d   : > { %645 = vxpose.xlu1.b32.cont [5/16] (narrow) %v629_v45, 8 }
 0x192   : > { %v602_v46 = vpop.xlane.xlu2 %601 }
 0x193   : > { %v630_v47 = vadd.f32 %v624_v35, %v602_v46 }
 0x195   : > { %646 = vxpose.xlu1.b32.cont [6/16] (narrow) %v630_v47, 8 }
 0x198   : > { %v618_v48 = vpop.xlane.xlu1 %617 }
 0x199   : > { %v638_v62 = vadd.f32 %v624_v35, %v618_v48 }
 0x19a   : > { %v604_v49 = vpop.xlane.xlu0 %603  ;;  %v608_v53 = vpop.xlane.xlu2 %607 }
 0x19b   : > { %v631_v50 = vadd.f32 %v624_v35, %v604_v49  ;;  %v633_v54 = vadd.f32 %v624_v35, %v608_v53 }
 0x19d   : > { %647 = vxpose.xlu1.b32.cont [7/16] (narrow) %v631_v50, 8 }
 0x1a2   : > { %v606_v51 = vpop.xlane.xlu1 %605  ;;  %v614_v58 = vpop.xlane.xlu2 %613 }
 0x1a3   : > { %v632_v52 = vadd.f32 %v624_v35, %v606_v51  ;;  %v610_v55 = vpop.xlane.xlu0 %609  ;;  %v636_v59 = vadd.f32 %v624_v35, %v614_v58 }
 0x1a4   : > { %v634_v56 = vadd.f32 %v624_v35, %v610_v55 }
 0x1a5   : > { %648 = vxpose.xlu1.b32.cont [8/16] (narrow) %v632_v52, 8 }
 0x1aa   : > { %v620_v63 = vpop.xlane.xlu2 %619 }
 0x1ab   : > { %v616_v60 = vpop.xlane.xlu0 %615  ;;  %v639_v1 = vadd.f32 %v624_v35, %v620_v63 }
 0x1ac   : > { %v637_v61 = vadd.f32 %v624_v35, %v616_v60 }
 0x1ad   : > { %649 = vxpose.xlu1.b32.cont [9/16] (narrow) %v633_v54, 8 }
 0x1b3   : > { %v622_v2 = vpop.xlane.xlu0 %621 }
 0x1b4   : > { %v640_v3 = vadd.f32 %v624_v35, %v622_v2 }
 0x1b5   : > { %650 = vxpose.xlu1.b32.cont [10/16] (narrow) %v634_v56, 8 }
 0x1bd   : > { %651 = vxpose.xlu1.b32.cont [11/16] (narrow) %v635_v57, 8 }
 0x1c5   : > { %652 = vxpose.xlu1.b32.cont [12/16] (narrow) %v636_v59, 8 }
 0x1cd   : > { %653 = vxpose.xlu1.b32.cont [13/16] (narrow) %v637_v61, 8 }
 0x1d5   : > { %654 = vxpose.xlu1.b32.cont [14/16] (narrow) %v638_v62, 8 }
 0x1dd   : > { %655 = vxpose.xlu1.b32.cont [15/16] (narrow) %v639_v1, 8 }
 0x1e5   : > { %656 = vxpose.xlu1.b32.end [16/16] (narrow) %v640_v3, 8 }
 0x211   : > { %v657_v4 = vpop.trf.xlu1 }
 0x212   : > { %673 = vst [vmem:[%s270_s27] sm:$0x1] %v657_v4 }
 0x213   : > { %1065 = shalt.err (!%p1062_p1)
}
 0x214   : > { %885 = dma.vmem_to_hbm [thread:$0]  (%p1201_p11), %s686_s11, 16, %s688_s18, %s675_s26  }
 0x215 PF: > { %s699_s17 = sand.u32 1, %s1096_s20   ;;  %p1419_p0 = scmp.ne.s32.totalorder %s1413_s7, 0 }
 0x216   : > { %p1420_p3 = scmp.ge.s32.totalorder %s1108_s23, 2  ;;  %s700_s19 = scalar_lea.sflag [#allocation5], %s699_s17 }
 0x218   : > { %p892_p7 = pnand %p1420_p3, %p1419_p0 }
 0x21a   : > { %p893_p8 = pneg %p892_p7 }
 0x21c   : > { %1091 = dma.done.wait (%p893_p8), %s700_s19, 16  }
 0x21d   : > { %1093 = vsyncadd (%p893_p8), %s700_s19, 4294967280  ;;  %p20_p4 = scmp.ge.s32.totalorder %s1174_s25, 4   ;;  %s1421_s20 = smov %s1100_s21 }
 0x21e   : > { %s1422_s21 = smov %s1104_s22  ;;  %s1423_s22 = smov %s1186_s28 }
 0x21f   : > { %s1424_s23 = smov %s1174_s25  ;;  %22 = sbr.rel (!%p20_p4) target bundleno = 8 (0x8), region = 89 }
 0x224   :  { %705 = vsyncpa [#allocation4], 1 }
 0x225   :  { %707 = vsyncpa [#allocation4 + $0x1], 1 }
 0x226   :  { %708 = vsyncpa [#allocation7], 1 }
 0x227   :  { %709 = vsyncpa [#allocation5], 1 }
 0x228   :  { %711 = vsyncpa [#allocation5 + $0x1], 1 }

</bundles_post_ra>
